<compile_context>
chip_gen: v5e
topology: v5e:2x2
jax: 0.10.0
libtpu: 0.0.40
codegen_flags: <defaults>
</compile_context>

<pallas_src>
import functools

import jax
import jax.numpy as jnp
from jax.experimental import pallas as pl
from jax.experimental.pallas import tpu as pltpu


def _cdiv(a, b):
    return -(-a // b)


def _round_up(x, m):
    return ((x + m - 1) // m) * m


def predictor_kernel(x_ref, w1_ref, b1_ref, w2_ref, b2_ref, o_ref):
    # ---- EncoderBlock: Linear(256 -> 128) + LeakyReLU(0.2) (+ Dropout=identity) ----
    x = x_ref[...].astype(jnp.bfloat16)            # in-kernel cast: no extra HBM pass
    h = jnp.dot(x, w1_ref[...], preferred_element_type=jnp.float32)
    h = h + b1_ref[...]                            # b1 is (1, 128), broadcasts over rows
    h = jnp.where(h >= 0.0, h, 0.2 * h)            # LeakyReLU(negative_slope=0.2)

    # ---- Linear(128 -> out_pad) ----  (padded columns: w2 == 0, b2 == -1e30)
    logits = jnp.dot(h.astype(w2_ref.dtype), w2_ref[...],
                     preferred_element_type=jnp.float32)
    logits = logits + b2_ref[...]

    # ---- Softmax over the (padded, lane-dense) feature axis ----
    m = jnp.max(logits, axis=1, keepdims=True)
    e = jnp.exp(logits - m)                        # padded lanes underflow to exactly 0
    denom = jnp.sum(e, axis=1, keepdims=True)
    o_ref[...] = (e * pl.reciprocal(denom, approx=True)).astype(o_ref.dtype)


@functools.partial(jax.jit, static_argnames=("tm_max",))
def predictor_forward(x, w1, b1, w2, b2, *, tm_max=512):
    B, in_dim = x.shape
    hid = w1.shape[1]
    out_dim = w2.shape[1]
    out_pad = max(128, _round_up(out_dim, 128))    # lane-dense output width

    # --- batch tiling: spread B evenly over the fewest <=tm_max-row tiles ---
    n_tiles = max(1, _cdiv(B, tm_max))
    tm = min(tm_max, _round_up(_cdiv(B, n_tiles), 8))
    b_pad = _round_up(B, tm)
    if b_pad != B:
        x = jnp.pad(x, ((0, b_pad - B), (0, 0)))

    # --- operand prep (tiny weights: cast/pad in wrapper; x stays f32) ---
    w1_bf = w1.astype(jnp.bfloat16)
    w2_p = jnp.zeros((hid, out_pad), jnp.float32).at[:, :out_dim].set(w2)
    w2_bf = w2_p.astype(jnp.bfloat16)
    b1_2d = b1.reshape(1, hid).astype(jnp.float32)
    # padded logit columns get a huge negative bias -> softmax prob exactly 0
    b2_2d = jnp.full((1, out_pad), -1e30, jnp.float32).at[0, :out_dim].set(b2)

    grid = (b_pad // tm,)

    cost = pl.CostEstimate(
        flops=2 * b_pad * (in_dim * hid + hid * out_pad),
        transcendentals=b_pad * (out_pad + 1),
        bytes_accessed=(b_pad * in_dim * 4 + w1_bf.size * 2 + w2_bf.size * 2
                        + b1_2d.size * 4 + b2_2d.size * 4
                        + b_pad * out_pad * 4),
    )

    y = pl.pallas_call(
        predictor_kernel,
        out_shape=jax.ShapeDtypeStruct((b_pad, out_pad), jnp.float32),
        grid_spec=pltpu.PrefetchScalarGridSpec(
            num_scalar_prefetch=0,
            grid=grid,
            in_specs=[
                pl.BlockSpec((tm, in_dim), lambda i: (i, 0)),      # x tile (f32)
                pl.BlockSpec((in_dim, hid), lambda i: (0, 0)),     # w1 (resident)
                pl.BlockSpec((1, hid), lambda i: (0, 0)),          # b1 (resident)
                pl.BlockSpec((hid, out_pad), lambda i: (0, 0)),    # w2 (resident)
                pl.BlockSpec((1, out_pad), lambda i: (0, 0)),      # b2 (resident)
            ],
            out_specs=pl.BlockSpec((tm, out_pad), lambda i: (i, 0)),
        ),
        compiler_params=pltpu.CompilerParams(
            dimension_semantics=("parallel",),
        ),
        cost_estimate=cost,
    )(x, w1_bf, b1_2d, w2_bf, b2_2d)

    return y[:B, :out_dim]


def init_params(key, in_dim=256, hidden_dim=128, output_size=10):
    """Deterministic PyTorch-Linear-style init: U(-1/sqrt(fan_in), 1/sqrt(fan_in))."""
    k1, k2, k3, k4 = jax.random.split(key, 4)
    bound1 = 1.0 / jnp.sqrt(in_dim)
    bound2 = 1.0 / jnp.sqrt(hidden_dim)
    w1 = jax.random.uniform(k1, (in_dim, hidden_dim), jnp.float32, -bound1, bound1)
    b1 = jax.random.uniform(k2, (hidden_dim,), jnp.float32, -bound1, bound1)
    w2 = jax.random.uniform(k3, (hidden_dim, output_size), jnp.float32, -bound2, bound2)
    b2 = jax.random.uniform(k4, (output_size,), jnp.float32, -bound2, bound2)
    return w1, b1, w2, b2


if __name__ == "__main__":
    key = jax.random.PRNGKey(0)
    k_x, k_p = jax.random.split(key)

    B, IN, HID, OUT = 8, 256, 128, 10
    x = jax.random.normal(k_x, (B, IN), dtype=jnp.float32)
    w1, b1, w2, b2 = init_params(k_p, IN, HID, OUT)

    out = predictor_forward(x, w1, b1, w2, b2)
    out = jax.block_until_ready(out)

    # Pure-JAX reference following the same bf16-operand / f32-accumulate path.
    x_bf, w1_bf, w2_bf = (x.astype(jnp.bfloat16), w1.astype(jnp.bfloat16),
                          w2.astype(jnp.bfloat16))
    h_ref = jnp.dot(x_bf, w1_bf, preferred_element_type=jnp.float32) + b1
    h_ref = jnp.where(h_ref >= 0, h_ref, 0.2 * h_ref)
    logits_ref = jnp.dot(h_ref.astype(jnp.bfloat16), w2_bf,
                         preferred_element_type=jnp.float32) + b2
    ref = jax.nn.softmax(logits_ref, axis=1)

    assert out.shape == (B, OUT)
    assert jnp.allclose(out, ref, atol=3e-3, rtol=3e-3), (
        f"max abs diff {jnp.max(jnp.abs(out - ref))}")
    assert jnp.allclose(jnp.sum(out, axis=1), 1.0, atol=3e-3)

    print("KERNEL_OK")
</pallas_src>

<mosaic_0001>
module attributes {stable_mosaic.version = 11 : i64} {
  func.func @predictor_kernel(%arg0: i32, %arg1: memref<8x256xf32, #tpu.memory_space<vmem>>, %arg2: memref<256x128xbf16, #tpu.memory_space<vmem>>, %arg3: memref<1x128xf32, #tpu.memory_space<vmem>>, %arg4: memref<128x128xbf16, #tpu.memory_space<vmem>>, %arg5: memref<1x128xf32, #tpu.memory_space<vmem>>, %arg6: memref<8x128xf32, #tpu.memory_space<vmem>>) attributes {dimension_semantics = [#tpu.dimension_semantics<parallel>], iteration_bounds = array<i64: 1>, scalar_prefetch = 0 : i64, scratch_operands = 0 : i64, tpu.core_type = #tpu.core_type<tc>, window_params = [{transform_indices = @transform_0, window_bounds = array<i64: 8, 256>}, {pipeline_mode = #tpu.pipeline_mode<synchronous>, transform_indices = @transform_1, window_bounds = array<i64: 256, 128>}, {pipeline_mode = #tpu.pipeline_mode<synchronous>, transform_indices = @transform_2, window_bounds = array<i64: 1, 128>}, {pipeline_mode = #tpu.pipeline_mode<synchronous>, transform_indices = @transform_3, window_bounds = array<i64: 128, 128>}, {pipeline_mode = #tpu.pipeline_mode<synchronous>, transform_indices = @transform_4, window_bounds = array<i64: 1, 128>}, {transform_indices = @transform_5, window_bounds = array<i64: 8, 128>}]} {
    %c0 = arith.constant 0 : index
    %c0_0 = arith.constant 0 : index
    %0 = vector.load %arg1[%c0, %c0_0] : memref<8x256xf32, #tpu.memory_space<vmem>>, vector<8x256xf32>
    %1 = arith.truncf %0 : vector<8x256xf32> to vector<8x256xbf16>
    %c0_1 = arith.constant 0 : index
    %c0_2 = arith.constant 0 : index
    %2 = vector.load %arg2[%c0_1, %c0_2] : memref<256x128xbf16, #tpu.memory_space<vmem>>, vector<256x128xbf16>
    %cst = arith.constant dense<0.000000e+00> : vector<8x128xf32>
    %3 = tpu.matmul %1, %2, %cst {dimension_numbers = #tpu.dot_dimension_numbers<[1], [0], [0], [1], [0, 0, 1, 1], [], []>} : vector<8x256xbf16>, vector<256x128xbf16>, vector<8x128xf32> -> vector<8x128xf32>
    %c0_3 = arith.constant 0 : index
    %c0_4 = arith.constant 0 : index
    %4 = vector.load %arg3[%c0_3, %c0_4] : memref<1x128xf32, #tpu.memory_space<vmem>>, vector<1x128xf32>
    %5 = vector.broadcast %4 : vector<1x128xf32> to vector<8x128xf32>
    %6 = arith.addf %3, %5 : vector<8x128xf32>
    %cst_5 = arith.constant 0.000000e+00 : f32
    %7 = vector.broadcast %cst_5 : f32 to vector<8x128xf32>
    %8 = arith.cmpf oge, %6, %7 : vector<8x128xf32>
    %cst_6 = arith.constant 2.000000e-01 : f32
    %9 = vector.broadcast %cst_6 : f32 to vector<8x128xf32>
    %10 = arith.mulf %9, %6 : vector<8x128xf32>
    %11 = arith.select %8, %6, %10 : vector<8x128xi1>, vector<8x128xf32>
    %12 = arith.truncf %11 : vector<8x128xf32> to vector<8x128xbf16>
    %c0_7 = arith.constant 0 : index
    %c0_8 = arith.constant 0 : index
    %13 = vector.load %arg4[%c0_7, %c0_8] : memref<128x128xbf16, #tpu.memory_space<vmem>>, vector<128x128xbf16>
    %cst_9 = arith.constant dense<0.000000e+00> : vector<8x128xf32>
    %14 = tpu.matmul %12, %13, %cst_9 {dimension_numbers = #tpu.dot_dimension_numbers<[1], [0], [0], [1], [0, 0, 1, 1], [], []>} : vector<8x128xbf16>, vector<128x128xbf16>, vector<8x128xf32> -> vector<8x128xf32>
    %c0_10 = arith.constant 0 : index
    %c0_11 = arith.constant 0 : index
    %15 = vector.load %arg5[%c0_10, %c0_11] : memref<1x128xf32, #tpu.memory_space<vmem>>, vector<1x128xf32>
    %16 = vector.broadcast %15 : vector<1x128xf32> to vector<8x128xf32>
    %17 = arith.addf %14, %16 : vector<8x128xf32>
    %cst_12 = arith.constant dense<0xFF800000> : vector<8xf32>
    %18 = vector.multi_reduction <maximumf>, %17, %cst_12 [1] : vector<8x128xf32> to vector<8xf32>
    %19 = vector.shape_cast %18 : vector<8xf32> to vector<8x1xf32>
    %20 = vector.broadcast %19 : vector<8x1xf32> to vector<8x128xf32>
    %21 = arith.subf %17, %20 : vector<8x128xf32>
    %22 = math.exp %21 : vector<8x128xf32>
    %cst_13 = arith.constant dense<0.000000e+00> : vector<8xf32>
    %23 = vector.multi_reduction <add>, %22, %cst_13 [1] : vector<8x128xf32> to vector<8xf32>
    %24 = vector.shape_cast %23 : vector<8xf32> to vector<8x1xf32>
    %25 = tpu.reciprocal %24 {approx = true} : vector<8x1xf32> -> vector<8x1xf32>
    %26 = vector.broadcast %25 : vector<8x1xf32> to vector<8x128xf32>
    %27 = arith.mulf %22, %26 : vector<8x128xf32>
    %c0_14 = arith.constant 0 : index
    %c0_15 = arith.constant 0 : index
    %28 = vector.load %arg6[%c0_14, %c0_15] : memref<8x128xf32, #tpu.memory_space<vmem>>, vector<8x128xf32>
    tpu.vector_store %arg6[%c0_14, %c0_15], %27 {strides = array<i32>} : memref<8x128xf32, #tpu.memory_space<vmem>>, vector<8x128xf32>,
    return
  }
  func.func @transform_0(%arg0: i32) -> (i32, i32) {
    %c0_i32 = arith.constant 0 : i32
    %c0_i32_0 = arith.constant 0 : i32
    return %arg0, %c0_i32 : i32, i32
  }
  func.func @transform_1(%arg0: i32) -> (i32, i32) {
    %c0_i32 = arith.constant 0 : i32
    %c0_i32_0 = arith.constant 0 : i32
    %c0_i32_1 = arith.constant 0 : i32
    return %c0_i32, %c0_i32_0 : i32, i32
  }
  func.func @transform_2(%arg0: i32) -> (i32, i32) {
    %c0_i32 = arith.constant 0 : i32
    %c0_i32_0 = arith.constant 0 : i32
    %c0_i32_1 = arith.constant 0 : i32
    return %c0_i32, %c0_i32_0 : i32, i32
  }
  func.func @transform_3(%arg0: i32) -> (i32, i32) {
    %c0_i32 = arith.constant 0 : i32
    %c0_i32_0 = arith.constant 0 : i32
    %c0_i32_1 = arith.constant 0 : i32
    return %c0_i32, %c0_i32_0 : i32, i32
  }
  func.func @transform_4(%arg0: i32) -> (i32, i32) {
    %c0_i32 = arith.constant 0 : i32
    %c0_i32_0 = arith.constant 0 : i32
    %c0_i32_1 = arith.constant 0 : i32
    return %c0_i32, %c0_i32_0 : i32, i32
  }
  func.func @transform_5(%arg0: i32) -> (i32, i32) {
    %c0_i32 = arith.constant 0 : i32
    %c0_i32_0 = arith.constant 0 : i32
    return %arg0, %c0_i32 : i32, i32
  }
}

</mosaic_0001>

<bundles_post_ra>
// kernel: predictor_forward.1
= control target key start
LH: loop header
LB: loop body
LE: loop exit
PB: predicated region body
PF: predicated region fallthrough
CT: control target
= control target key end

     0   :  { %s565_s0 = inlined_call_operand.vmem [shape: f32[8,256], index: 0, kind: input, shape index: {}]   ;;  %s566_s1 = inlined_call_operand.vmem [shape: bf16[256,128], index: 1, kind: input, shape index: {}]   ;;  %s567_s2 = inlined_call_operand.vmem [shape: f32[1,128], index: 2, kind: input, shape index: {}]   ;;  %s568_s3 = inlined_call_operand.vmem [shape: bf16[128,128], index: 3, kind: input, shape index: {}]   ;;  %s569_s4 = inlined_call_operand.vmem [shape: f32[1,128], index: 4, kind: input, shape index: {}]   ;;  %s570_s5 = inlined_call_operand.hbm [shape: f32[8,128], index: 5, kind: output, shape index: {}]  }
   0x1   :  { %v397_v0 = vld [vmem:[%s566_s1 + $0x38] sm:$0xff]  ;;  %v396_v2 = vld [vmem:[%s566_s1 + $0x30] sm:$0xff]  ;;  %v395_v4 = vld [vmem:[%s566_s1 + $0x28] sm:$0xff] }
   0x2   :  { %v405_v1 = vld [vmem:[%s566_s1 + $0x78] sm:$0xff]  ;;  %157 = vmatpush.bf16.msra.mxu0 %v397_v0  ;;  %v404_v3 = vld [vmem:[%s566_s1 + $0x70] sm:$0xff]  ;;  %v403_v5 = vld [vmem:[%s566_s1 + $0x68] sm:$0xff] }
   0x3   :  { %170 = vmatpush.bf16.msra.mxu1 %v405_v1  ;;  %v413_v6 = vld [vmem:[%s568_s3 + $0x38] sm:$0xff]  ;;  %v412_v7 = vld [vmem:[%s568_s3 + $0x30] sm:$0xff] }
   0x4   :  { %255 = vmatpush.bf16.msra.mxu2 %v413_v6 }
   0x6   :  { %158 = vmatpush.bf16.msra.mxu0 %v396_v2 }
   0x7   :  { %171 = vmatpush.bf16.msra.mxu1 %v404_v3 }
   0x8   :  { %10 = vsyncpa [#allocation3], 0  ;;  %v394_v8 = vld [vmem:[%s566_s1 + $0x20] sm:$0xff]  ;;  %256 = vmatpush.bf16.msra.mxu2 %v412_v7  ;;  %v411_v10 = vld [vmem:[%s568_s3 + $0x28] sm:$0xff]  ;;  %s285_s24 = sshll.u32 %s570_s5, 4  ;;  %s286_s24 = int_to_ptr.hbm [resolvable:$true] %s285_s24 }
   0x9   :  { %v402_v9 = vld [vmem:[%s566_s1 + $0x60] sm:$0xff]  ;;  %v393_v11 = vld [vmem:[%s566_s1 + $0x18] sm:$0xff]  ;;  %v392_v14 = vld [vmem:[%s566_s1 + $0x10] sm:$0xff] }
   0xa   :  { %159 = vmatpush.bf16.msra.mxu0 %v395_v4  ;;  %v401_v12 = vld [vmem:[%s566_s1 + $0x58] sm:$0xff]  ;;  %v410_v13 = vld [vmem:[%s568_s3 + $0x20] sm:$0xff]  ;;  %v400_v15 = vld [vmem:[%s566_s1 + $0x50] sm:$0xff] }
   0xb   :  { %172 = vmatpush.bf16.msra.mxu1 %v403_v5  ;;  %v409_v16 = vld [vmem:[%s568_s3 + $0x18] sm:$0xff]  ;;  %v391_v17 = vld [vmem:[%s566_s1 + $0x8] sm:$0xff]  ;;  %v408_v19 = vld [vmem:[%s568_s3 + $0x10] sm:$0xff] }
   0xc   :  { %257 = vmatpush.bf16.msra.mxu2 %v411_v10  ;;  %v399_v18 = vld [vmem:[%s566_s1 + $0x48] sm:$0xff]  ;;  %v390_v20 = vld [vmem:[%s566_s1] sm:$0xff] }
   0xd   :  { %v398_v21 = vld [vmem:[%s566_s1 + $0x40] sm:$0xff]  ;;  %v22_v23 = vld [vmem:[%s565_s0 + $0x8] sm:$0xff] }
   0xe   :  { %160 = vmatpush.bf16.msra.mxu0 %v394_v8  ;;  %v21_v22 = vld [vmem:[%s565_s0] sm:$0xff]  ;;  %v24_v25 = vpack.c.bf16 %v22_v23, %v22_v23  ;;  %v407_v26 = vld [vmem:[%s568_s3 + $0x8] sm:$0xff] }
   0xf   :  { %173 = vmatpush.bf16.msra.mxu1 %v402_v9  ;;  %v23_v24 = vpack.c.bf16 %v21_v22, %v21_v22  ;;  %v406_v27 = vld [vmem:[%s568_s3] sm:$0xff] }
  0x10   :  { %258 = vmatpush.bf16.msra.mxu2 %v410_v13  ;;  %v415_v28 = vld [vmem:[%s567_s2] ss:$0 sm:$0xff]  ;;  %s447_s2 = smov [#allocation2]  }
  0x11   :  { %v416_v38 = vld [vmem:[%s569_s4] ss:$0 sm:$0xff]  ;;  %s283_s3 = sshll.u32 %s447_s2, 4  ;;  %s284_s3 = int_to_ptr.vmem [resolvable:$true] %s283_s3 }
  0x12   :  { %161 = vmatpush.bf16.msra.mxu0 %v393_v11 }
  0x13   :  { %174 = vmatpush.bf16.msra.mxu1 %v401_v12 }
  0x14   :  { %259 = vmatpush.bf16.msra.mxu2 %v409_v16 }
  0x16   :  { %162 = vmatpush.bf16.msra.mxu0 %v392_v14 }
  0x17   :  { %175 = vmatpush.bf16.msra.mxu1 %v400_v15 }
  0x18   :  { %260 = vmatpush.bf16.msra.mxu2 %v408_v19 }
  0x1a   :  { %163 = vmatpush.bf16.msra.mxu0 %v391_v17 }
  0x1b   :  { %176 = vmatpush.bf16.msra.mxu1 %v399_v18 }
  0x1c   :  { %261 = vmatpush.bf16.msra.mxu2 %v407_v26 }
  0x1e   :  { %164 = vmatpush.bf16.msra.mxu0 %v390_v20 }
  0x1f   :  { %177 = vmatpush.bf16.msra.mxu1 %v398_v21 }
  0x20   :  { %262 = vmatpush.bf16.msra.mxu2 %v406_v27 }
  0x21   :  { %165 = vmatmul.bf16.vlgmr.msra.gmra.mxu0 %v23_v24 }
  0x22   :  { %178 = vmatmul.bf16.vlgmr.msra.gmra.mxu1 %v24_v25 }
  0x9e   :  { %v166_v29 = vpop.f32.mrf.mxu0 }
  0x9f   :  { %v179_v30 = vpop.f32.mrf.mxu1  ;;  %v167_v31 = vadd.f32 %v415_v28, %v166_v29 }
  0xa1   :  { %v180_v32 = vadd.f32 %v179_v30, %v167_v31 }
  0xa3   :  { %v184_v33 = vmul.f32 0.2, %v180_v32  ;;  %vm183_vm0 = vcmp.ge.f32.partialorder %v180_v32, 0.0 }
  0xa5   :  { %v185_v34 = vsel %vm183_vm0, %v180_v32, %v184_v33 }
  0xa6   :  { %v168_v35 = vpop.f32.mrf.mxu0  ;;  %v186_v37 = vpack.c.bf16 %v185_v34, %v185_v34 }
  0xa7   :  { %v181_v36 = vpop.f32.mrf.mxu1 }
  0xa8   :  { %263 = vmatmul.bf16.vlgmr.msra.gmra.mxu2 %v186_v37 }
 0x12b   :  { %v264_v39 = vpop.f32.mrf.mxu2 }
 0x12c   :  { %v265_v40 = vadd.f32 %v416_v38, %v264_v39 }
 0x12e   :  { %268 = vmax.xlane.f32.xlu0 %v265_v40 }
 0x133   :  { %v266_v41 = vpop.f32.mrf.mxu2 }
 0x1a1   :  { %v269_v42 = vpop.xlane.xlu0 %268 }
 0x1a2   :  { %v270_v43 = vsub.f32 %v265_v40, %v269_v42 }
 0x1a4   :  { %v271_v44 = vmul.f32 1.442695, %v270_v43 }
 0x1a6   :  { %417 = vpow2.f32 %v271_v44 }
 0x1ac   :  { %v418_v45 = vpop.eup %417 }
 0x1ad   :  { %273 = vadd.xlane.f32.xlu0 %v418_v45 }
 0x220   :  { %v274_v46 = vpop.xlane.xlu0 %273 }
 0x221   :  { %419 = vrcp.f32 %v274_v46 }
 0x227   :  { %v420_v47 = vpop.eup %419 }
 0x228   :  { %v276_v48 = vmul.f32 %v420_v47, %v418_v45 }
 0x22a   :  { %277 = vst [vmem:[#allocation2] sm:$0xff] %v276_v48 }
 0x22b   :  { %288 = dma.vmem_to_hbm [thread:$0]  %s284_s3, 128, %s286_s24, [#allocation3]  }
 0x22c   :  { %445 = dma.done.wait [#allocation3], 128  }
 0x22d   :  { %446 = vsyncadd [#allocation3], 4294967168 }
 0x22e   :  { %293 = vsyncpa [#allocation3], 1 }

</bundles_post_ra>
